<compile_context>
chip_gen: v7x
topology: tpu7x:2x2x1
jax: 0.10.0
libtpu: 0.0.40
codegen_flags: <defaults>
</compile_context>

<pallas_src>
import functools

import jax
import jax.numpy as jnp
from jax.experimental import pallas as pl
from jax.experimental.pallas import tpu as pltpu

_MIB = 1024 * 1024


# ---------------------------------------------------------------------------
# Kernels
# ---------------------------------------------------------------------------
def _stats_kernel(total_l, lt, x_ref, out_ref):
    """Accumulate raw per-channel sums for one N-partition.

    x_ref:   (nb, 2, C, lt)  current tile (real slab, imag slab), input dtype
    out_ref: (5, C, 1) f32   resident partial sums for this N-partition:
                             [sum_r, sum_i, sum_rr, sum_ii, sum_ri]
    """
    l_i = pl.program_id(1)

    @pl.when(l_i == 0)
    def _init():
        out_ref[...] = jnp.zeros_like(out_ref)

    x = x_ref[...].astype(jnp.float32)        # (nb, 2, C, lt)
    xr = x[:, 0]                              # (nb, C, lt)
    xi = x[:, 1]
    if total_l % lt != 0:
        # Last lane tile sticks past L: mask out-of-bounds garbage before reducing.
        lane = jax.lax.broadcasted_iota(jnp.int32, xr.shape, 2)
        valid = (l_i * lt + lane) < total_l
        xr = jnp.where(valid, xr, 0.0)
        xi = jnp.where(valid, xi, 0.0)

    def _psum(v):  # (nb, C, lt) -> (C, 1); lane reduce then batch reduce
        return jnp.sum(jnp.sum(v, axis=2, keepdims=True), axis=0)

    out_ref[0] += _psum(xr)
    out_ref[1] += _psum(xi)
    out_ref[2] += _psum(xr * xr)
    out_ref[3] += _psum(xi * xi)
    out_ref[4] += _psum(xr * xi)


def _apply_kernel(x_ref, p_ref, o_ref):
    """out[:, j] = coefR[j]*x_r + coefI[j]*x_i + bias[j]   (j = 0 real, 1 imag)."""
    x = x_ref[...].astype(jnp.float32)        # (nb, 2, C, lt)
    p = p_ref[...]                            # (3, 2, C, 1) f32: [coefR, coefI, bias]
    xr = x[:, 0:1]                            # (nb, 1, C, lt)
    xi = x[:, 1:2]
    o_ref[...] = (p[0] * xr + p[1] * xi + p[2]).astype(o_ref.dtype)


# ---------------------------------------------------------------------------
# Tiling helpers
# ---------------------------------------------------------------------------
def _vmem_capacity_bytes():
    """Physical per-core VMEM; conservative (v7x-sized) fallback if unknown."""
    try:
        return int(pltpu.get_tpu_info().vmem_capacity_bytes)
    except Exception:
        return 64 * _MIB


def _largest_divisor_leq(n, cap):
    cap = max(1, min(n, int(cap)))
    for d in range(cap, 0, -1):
        if n % d == 0:
            return d
    return 1


def _choose_block(n, c, length, itemsize, target_bytes, reserve_two_n_blocks):
    """Pick (nb, lt) so a (nb, 2, C, lt) block holds roughly target_bytes."""
    per_lane = 2 * c * itemsize
    lt_cap = max(128, (target_bytes // per_lane) // 128 * 128)
    if length <= lt_cap:
        lt = length                           # full rows (block dim == array dim is legal)
        nb_cap = max(1, target_bytes // max(1, per_lane * length))
        if reserve_two_n_blocks and n >= 2:
            nb_cap = min(nb_cap, n // 2)      # keep >=2 N-blocks so megacore splits pass 1
        nb = _largest_divisor_leq(n, nb_cap)
    else:
        lt = lt_cap                           # multiple of 128; last tile masked / clipped
        nb = 1
    return nb, lt


# ---------------------------------------------------------------------------
# Forward
# ---------------------------------------------------------------------------
def cbatchnorm_forward(x, gamma_rr, gamma_ii, gamma_ri, beta_r, beta_i):
    """x: (N, 2*C, L).  Returns (N, 2*C, L) in x.dtype, matching CBatchNorm.forward."""
    n, two_c, length = x.shape
    c = two_c // 2
    # Layout-preserving split of the channel axis (no HBM transpose, no dtype cast):
    # channel k in [0, C) -> (0, k) real slab ; k in [C, 2C) -> (1, k - C) imag slab.
    x4 = x.reshape(n, 2, c, length)
    itemsize = x.dtype.itemsize

    big_vmem = _vmem_capacity_bytes() >= 100 * _MIB   # v5e/v6e: 128 MiB; v7x: 64 MiB
    p1_target = (12 if big_vmem else 8) * _MIB        # pass 1 live set ~ 2 input buffers
    p2_target = (8 if big_vmem else 4) * _MIB         # pass 2 live set ~ 4 buffers + temps
    vmem_limit = (80 if big_vmem else 48) * _MIB

    nb1, lt1 = _choose_block(n, c, length, itemsize, p1_target, True)
    nb2, lt2 = _choose_block(n, c, length, itemsize, p2_target, False)
    grid1 = (n // nb1, pl.cdiv(length, lt1))
    grid2 = (n // nb2, pl.cdiv(length, lt2))

    # ---- Pass 1: per-N-partition raw per-channel sums (megacore-parallel). ----
    partials = pl.pallas_call(
        functools.partial(_stats_kernel, length, lt1),
        out_shape=jax.ShapeDtypeStruct((grid1[0], 5, c, 1), jnp.float32),
        grid_spec=pltpu.PrefetchScalarGridSpec(
            num_scalar_prefetch=0,
            grid=grid1,
            in_specs=[pl.BlockSpec((nb1, 2, c, lt1), lambda i, l: (i, 0, 0, l))],
            out_specs=pl.BlockSpec((None, 5, c, 1), lambda i, l: (i, 0, 0, 0)),
        ),
        compiler_params=pltpu.CompilerParams(
            dimension_semantics=("parallel", "arbitrary"),
            vmem_limit_bytes=vmem_limit,
        ),
    )(x4)

    # ---- Tiny finalize in plain JAX (O(C) work): mean, covariance, inverse matrix
    #      sqrt, and fold the complex affine + centering into per-channel constants
    #      A (2x2) and b' = beta - A @ mu. ----
    inv_m = 1.0 / float(n * length)
    s_r, s_i, s_rr, s_ii, s_ri = jnp.sum(partials[..., 0], axis=0)   # each (C,)
    mu_r = s_r * inv_m
    mu_i = s_i * inv_m
    vrr = s_rr * inv_m - mu_r * mu_r
    vii = s_ii * inv_m - mu_i * mu_i
    vri = s_ri * inv_m - mu_r * mu_i
    tau = vrr + vii
    delta = jnp.maximum(vrr * vii - vri * vri, 0.0)  # clamp guards fp rounding only (no eps, like reference)
    s = jnp.sqrt(delta)
    t = jnp.sqrt(tau + 2.0 * s)
    inv_st = 1.0 / (s * t)
    wrr = (vii + s) * inv_st
    wii = (vrr + s) * inv_st
    wri = -vri * inv_st
    grr = gamma_rr.astype(jnp.float32)
    gii = gamma_ii.astype(jnp.float32)
    gri = gamma_ri.astype(jnp.float32)
    br = beta_r.astype(jnp.float32)
    bi = beta_i.astype(jnp.float32)
    arr = grr * wrr + gri * wri      # coefficient of x_r in out_r
    ari = grr * wri + gri * wii      # coefficient of x_i in out_r
    air = gii * wri + gri * wrr      # coefficient of x_r in out_i
    aii = gii * wii + gri * wri      # coefficient of x_i in out_i
    br2 = br - arr * mu_r - ari * mu_i
    bi2 = bi - air * mu_r - aii * mu_i
    params = jnp.stack([
        jnp.stack([arr, air]),       # multiplies x_r   -> (2, C)
        jnp.stack([ari, aii]),       # multiplies x_i
        jnp.stack([br2, bi2]),       # bias
    ]).reshape(3, 2, c, 1)

    # ---- Pass 2: normalize + affine, embarrassingly parallel over (N, L). ----
    out4 = pl.pallas_call(
        _apply_kernel,
        out_shape=jax.ShapeDtypeStruct((n, 2, c, length), x.dtype),
        grid_spec=pltpu.PrefetchScalarGridSpec(
            num_scalar_prefetch=0,
            grid=grid2,
            in_specs=[
                pl.BlockSpec((nb2, 2, c, lt2), lambda i, l: (i, 0, 0, l)),
                pl.BlockSpec((3, 2, c, 1), lambda i, l: (0, 0, 0, 0)),
            ],
            out_specs=pl.BlockSpec((nb2, 2, c, lt2), lambda i, l: (i, 0, 0, l)),
        ),
        compiler_params=pltpu.CompilerParams(
            dimension_semantics=("parallel", "parallel"),
            vmem_limit_bytes=vmem_limit,
        ),
    )(x4, params)

    return out4.reshape(n, two_c, length)


# ---------------------------------------------------------------------------
# Pure-JAX reference (port of the PyTorch forward) for the correctness check.
# ---------------------------------------------------------------------------
def _reference(x, gamma_rr, gamma_ii, gamma_ri, beta_r, beta_i):
    n, two_c, length = x.shape
    c = two_c // 2
    mu = jnp.mean(x, axis=(0, 2)).reshape(1, two_c, 1)
    xc = x - mu
    xr, xi = xc[:, :c], xc[:, c:]
    vrr = jnp.mean(xr * xr, axis=(0, 2)).reshape(1, c, 1)
    vii = jnp.mean(xi * xi, axis=(0, 2)).reshape(1, c, 1)
    vri = jnp.mean(xr * xi, axis=(0, 2)).reshape(1, c, 1)
    tau = vrr + vii
    delta = vrr * vii - vri ** 2
    s = jnp.sqrt(delta)
    t = jnp.sqrt(tau + 2 * s)
    inv_st = 1.0 / (s * t)
    wrr = (vii + s) * inv_st
    wii = (vrr + s) * inv_st
    wri = -vri * inv_st
    std_r = wrr * xr + wri * xi
    std_i = wii * xi + wri * xr
    grr = gamma_rr.reshape(1, c, 1)
    gii = gamma_ii.reshape(1, c, 1)
    gri = gamma_ri.reshape(1, c, 1)
    br = beta_r.reshape(1, c, 1)
    bi = beta_i.reshape(1, c, 1)
    out_r = grr * std_r + gri * std_i + br
    out_i = gii * std_i + gri * std_r + bi
    return jnp.concatenate([out_r, out_i], axis=1)


if __name__ == "__main__":
    # Module config: CBatchNorm(channel=4) -> input channel axis = 2*channel = 8.
    channel = 4
    n_batch, seq_len = 2, 16

    key = jax.random.PRNGKey(0)
    x = jax.random.normal(key, (n_batch, 2 * channel, seq_len), dtype=jnp.float32)

    # Deterministic parameter init, matching __init__ (sqrt_init / zeros):
    gamma_rr = jnp.full((channel,), 1.0 / jnp.sqrt(2.0), dtype=jnp.float32)
    gamma_ii = jnp.full((channel,), 1.0 / jnp.sqrt(2.0), dtype=jnp.float32)
    gamma_ri = jnp.zeros((channel,), dtype=jnp.float32)
    beta_r = jnp.zeros((channel,), dtype=jnp.float32)
    beta_i = jnp.zeros((channel,), dtype=jnp.float32)

    out = cbatchnorm_forward(x, gamma_rr, gamma_ii, gamma_ri, beta_r, beta_i)
    out = jax.block_until_ready(out)
    ref = _reference(x, gamma_rr, gamma_ii, gamma_ri, beta_r, beta_i)
    assert out.shape == (n_batch, 2 * channel, seq_len)
    assert out.dtype == x.dtype
    assert jnp.allclose(out, ref, atol=1e-4, rtol=1e-4)

    # Exercise the reduced-precision path (stats/affine still computed in f32 in-kernel).
    x_bf16 = x.astype(jnp.bfloat16)
    out_bf16 = jax.block_until_ready(
        cbatchnorm_forward(x_bf16, gamma_rr, gamma_ii, gamma_ri, beta_r, beta_i))
    ref_bf16 = _reference(x_bf16.astype(jnp.float32), gamma_rr, gamma_ii,
                          gamma_ri, beta_r, beta_i)
    assert out_bf16.dtype == jnp.bfloat16
    assert bool(jnp.all(jnp.isfinite(out_bf16.astype(jnp.float32))))
    assert jnp.allclose(out_bf16.astype(jnp.float32), ref_bf16, atol=5e-2, rtol=5e-2)

    print("KERNEL_OK")
</pallas_src>

<mosaic_0001>
module attributes {stable_mosaic.version = 11 : i64} {
  func.func @_stats_kernel(%arg0: i32, %arg1: i32, %arg2: memref<1x2x4x16xf32, #tpu.memory_space<vmem>>, %arg3: memref<1x5x4x1xf32, #tpu.memory_space<vmem>>) attributes {dimension_semantics = [#tpu.dimension_semantics<parallel>, #tpu.dimension_semantics<arbitrary>], iteration_bounds = array<i64: 2, 1>, scalar_prefetch = 0 : i64, scratch_operands = 0 : i64, tpu.core_type = #tpu.core_type<tc>, window_params = [{transform_indices = @transform_0, window_bounds = array<i64: 1, 2, 4, 16>}, {transform_indices = @transform_1, window_bounds = array<i64: 1, 5, 4, 1>}]} {
    %c0_i32 = arith.constant 0 : i32
    %0 = arith.cmpi eq, %arg1, %c0_i32 : i32
    %1 = arith.extui %0 : i1 to i32
    %c0_i32_0 = arith.constant 0 : i32
    %2 = arith.cmpi ne, %1, %c0_i32_0 : i32
    scf.if %2 {
      %cst_49 = arith.constant 0.000000e+00 : f32
      %56 = vector.broadcast %cst_49 : f32 to vector<5x4x1xf32>
      %c0_50 = arith.constant 0 : index
      %c0_51 = arith.constant 0 : index
      %c0_52 = arith.constant 0 : index
      %c0_53 = arith.constant 0 : index
      %57 = vector.load %arg3[%c0_50, %c0_51, %c0_52, %c0_53] : memref<1x5x4x1xf32, #tpu.memory_space<vmem>>, vector<1x5x4x1xf32>
      %58 = vector.shape_cast %57 : vector<1x5x4x1xf32> to vector<5x4x1xf32>
      %59 = vector.shape_cast %56 : vector<5x4x1xf32> to vector<1x5x4x1xf32>
      tpu.vector_store %arg3[%c0_50, %c0_51, %c0_52, %c0_53], %59 {strides = array<i32>} : memref<1x5x4x1xf32, #tpu.memory_space<vmem>>, vector<1x5x4x1xf32>,
    } else {
    }
    %c0 = arith.constant 0 : index
    %c0_1 = arith.constant 0 : index
    %c0_2 = arith.constant 0 : index
    %c0_3 = arith.constant 0 : index
    %3 = vector.load %arg2[%c0, %c0_1, %c0_2, %c0_3] : memref<1x2x4x16xf32, #tpu.memory_space<vmem>>, vector<1x2x4x16xf32>
    %4 = vector.extract_strided_slice %3 {offsets = [0, 0, 0, 0], sizes = [1, 1, 4, 16], strides = [1, 1, 1, 1]} : vector<1x2x4x16xf32> to vector<1x1x4x16xf32>
    %5 = vector.shape_cast %4 : vector<1x1x4x16xf32> to vector<1x4x16xf32>
    %6 = vector.extract_strided_slice %3 {offsets = [0, 1, 0, 0], sizes = [1, 1, 4, 16], strides = [1, 1, 1, 1]} : vector<1x2x4x16xf32> to vector<1x1x4x16xf32>
    %7 = vector.shape_cast %6 : vector<1x1x4x16xf32> to vector<1x4x16xf32>
    %c0_4 = arith.constant 0 : index
    %c0_5 = arith.constant 0 : index
    %c0_6 = arith.constant 0 : index
    %c0_7 = arith.constant 0 : index
    %8 = vector.load %arg3[%c0_4, %c0_5, %c0_6, %c0_7] : memref<1x5x4x1xf32, #tpu.memory_space<vmem>>, vector<1x1x4x1xf32>
    %9 = vector.shape_cast %8 : vector<1x1x4x1xf32> to vector<4x1xf32>
    %cst = arith.constant dense<0.000000e+00> : vector<1x4xf32>
    %10 = vector.multi_reduction <add>, %5, %cst [2] : vector<1x4x16xf32> to vector<1x4xf32>
    %11 = vector.shape_cast %10 : vector<1x4xf32> to vector<1x4x1xf32>
    %cst_8 = arith.constant dense<0.000000e+00> : vector<4x1xf32>
    %12 = vector.multi_reduction <add>, %11, %cst_8 [0] : vector<1x4x1xf32> to vector<4x1xf32>
    %13 = arith.addf %9, %12 : vector<4x1xf32>
    %c0_9 = arith.constant 0 : index
    %c0_10 = arith.constant 0 : index
    %c0_11 = arith.constant 0 : index
    %c0_12 = arith.constant 0 : index
    %14 = vector.load %arg3[%c0_9, %c0_10, %c0_11, %c0_12] : memref<1x5x4x1xf32, #tpu.memory_space<vmem>>, vector<1x1x4x1xf32>
    %15 = vector.shape_cast %14 : vector<1x1x4x1xf32> to vector<4x1xf32>
    %16 = vector.shape_cast %13 : vector<4x1xf32> to vector<1x1x4x1xf32>
    tpu.vector_store %arg3[%c0_9, %c0_10, %c0_11, %c0_12], %16 {strides = array<i32>} : memref<1x5x4x1xf32, #tpu.memory_space<vmem>>, vector<1x1x4x1xf32>,
    %c0_13 = arith.constant 0 : index
    %c1 = arith.constant 1 : index
    %c0_14 = arith.constant 0 : index
    %c0_15 = arith.constant 0 : index
    %17 = vector.load %arg3[%c0_13, %c1, %c0_14, %c0_15] : memref<1x5x4x1xf32, #tpu.memory_space<vmem>>, vector<1x1x4x1xf32>
    %18 = vector.shape_cast %17 : vector<1x1x4x1xf32> to vector<4x1xf32>
    %cst_16 = arith.constant dense<0.000000e+00> : vector<1x4xf32>
    %19 = vector.multi_reduction <add>, %7, %cst_16 [2] : vector<1x4x16xf32> to vector<1x4xf32>
    %20 = vector.shape_cast %19 : vector<1x4xf32> to vector<1x4x1xf32>
    %cst_17 = arith.constant dense<0.000000e+00> : vector<4x1xf32>
    %21 = vector.multi_reduction <add>, %20, %cst_17 [0] : vector<1x4x1xf32> to vector<4x1xf32>
    %22 = arith.addf %18, %21 : vector<4x1xf32>
    %c0_18 = arith.constant 0 : index
    %c1_19 = arith.constant 1 : index
    %c0_20 = arith.constant 0 : index
    %c0_21 = arith.constant 0 : index
    %23 = vector.load %arg3[%c0_18, %c1_19, %c0_20, %c0_21] : memref<1x5x4x1xf32, #tpu.memory_space<vmem>>, vector<1x1x4x1xf32>
    %24 = vector.shape_cast %23 : vector<1x1x4x1xf32> to vector<4x1xf32>
    %25 = vector.shape_cast %22 : vector<4x1xf32> to vector<1x1x4x1xf32>
    tpu.vector_store %arg3[%c0_18, %c1_19, %c0_20, %c0_21], %25 {strides = array<i32>} : memref<1x5x4x1xf32, #tpu.memory_space<vmem>>, vector<1x1x4x1xf32>,
    %c0_22 = arith.constant 0 : index
    %c2 = arith.constant 2 : index
    %c0_23 = arith.constant 0 : index
    %c0_24 = arith.constant 0 : index
    %26 = vector.load %arg3[%c0_22, %c2, %c0_23, %c0_24] : memref<1x5x4x1xf32, #tpu.memory_space<vmem>>, vector<1x1x4x1xf32>
    %27 = vector.shape_cast %26 : vector<1x1x4x1xf32> to vector<4x1xf32>
    %28 = arith.mulf %5, %5 : vector<1x4x16xf32>
    %cst_25 = arith.constant dense<0.000000e+00> : vector<1x4xf32>
    %29 = vector.multi_reduction <add>, %28, %cst_25 [2] : vector<1x4x16xf32> to vector<1x4xf32>
    %30 = vector.shape_cast %29 : vector<1x4xf32> to vector<1x4x1xf32>
    %cst_26 = arith.constant dense<0.000000e+00> : vector<4x1xf32>
    %31 = vector.multi_reduction <add>, %30, %cst_26 [0] : vector<1x4x1xf32> to vector<4x1xf32>
    %32 = arith.addf %27, %31 : vector<4x1xf32>
    %c0_27 = arith.constant 0 : index
    %c2_28 = arith.constant 2 : index
    %c0_29 = arith.constant 0 : index
    %c0_30 = arith.constant 0 : index
    %33 = vector.load %arg3[%c0_27, %c2_28, %c0_29, %c0_30] : memref<1x5x4x1xf32, #tpu.memory_space<vmem>>, vector<1x1x4x1xf32>
    %34 = vector.shape_cast %33 : vector<1x1x4x1xf32> to vector<4x1xf32>
    %35 = vector.shape_cast %32 : vector<4x1xf32> to vector<1x1x4x1xf32>
    tpu.vector_store %arg3[%c0_27, %c2_28, %c0_29, %c0_30], %35 {strides = array<i32>} : memref<1x5x4x1xf32, #tpu.memory_space<vmem>>, vector<1x1x4x1xf32>,
    %c0_31 = arith.constant 0 : index
    %c3 = arith.constant 3 : index
    %c0_32 = arith.constant 0 : index
    %c0_33 = arith.constant 0 : index
    %36 = vector.load %arg3[%c0_31, %c3, %c0_32, %c0_33] : memref<1x5x4x1xf32, #tpu.memory_space<vmem>>, vector<1x1x4x1xf32>
    %37 = vector.shape_cast %36 : vector<1x1x4x1xf32> to vector<4x1xf32>
    %38 = arith.mulf %7, %7 : vector<1x4x16xf32>
    %cst_34 = arith.constant dense<0.000000e+00> : vector<1x4xf32>
    %39 = vector.multi_reduction <add>, %38, %cst_34 [2] : vector<1x4x16xf32> to vector<1x4xf32>
    %40 = vector.shape_cast %39 : vector<1x4xf32> to vector<1x4x1xf32>
    %cst_35 = arith.constant dense<0.000000e+00> : vector<4x1xf32>
    %41 = vector.multi_reduction <add>, %40, %cst_35 [0] : vector<1x4x1xf32> to vector<4x1xf32>
    %42 = arith.addf %37, %41 : vector<4x1xf32>
    %c0_36 = arith.constant 0 : index
    %c3_37 = arith.constant 3 : index
    %c0_38 = arith.constant 0 : index
    %c0_39 = arith.constant 0 : index
    %43 = vector.load %arg3[%c0_36, %c3_37, %c0_38, %c0_39] : memref<1x5x4x1xf32, #tpu.memory_space<vmem>>, vector<1x1x4x1xf32>
    %44 = vector.shape_cast %43 : vector<1x1x4x1xf32> to vector<4x1xf32>
    %45 = vector.shape_cast %42 : vector<4x1xf32> to vector<1x1x4x1xf32>
    tpu.vector_store %arg3[%c0_36, %c3_37, %c0_38, %c0_39], %45 {strides = array<i32>} : memref<1x5x4x1xf32, #tpu.memory_space<vmem>>, vector<1x1x4x1xf32>,
    %c0_40 = arith.constant 0 : index
    %c4 = arith.constant 4 : index
    %c0_41 = arith.constant 0 : index
    %c0_42 = arith.constant 0 : index
    %46 = vector.load %arg3[%c0_40, %c4, %c0_41, %c0_42] : memref<1x5x4x1xf32, #tpu.memory_space<vmem>>, vector<1x1x4x1xf32>
    %47 = vector.shape_cast %46 : vector<1x1x4x1xf32> to vector<4x1xf32>
    %48 = arith.mulf %5, %7 : vector<1x4x16xf32>
    %cst_43 = arith.constant dense<0.000000e+00> : vector<1x4xf32>
    %49 = vector.multi_reduction <add>, %48, %cst_43 [2] : vector<1x4x16xf32> to vector<1x4xf32>
    %50 = vector.shape_cast %49 : vector<1x4xf32> to vector<1x4x1xf32>
    %cst_44 = arith.constant dense<0.000000e+00> : vector<4x1xf32>
    %51 = vector.multi_reduction <add>, %50, %cst_44 [0] : vector<1x4x1xf32> to vector<4x1xf32>
    %52 = arith.addf %47, %51 : vector<4x1xf32>
    %c0_45 = arith.constant 0 : index
    %c4_46 = arith.constant 4 : index
    %c0_47 = arith.constant 0 : index
    %c0_48 = arith.constant 0 : index
    %53 = vector.load %arg3[%c0_45, %c4_46, %c0_47, %c0_48] : memref<1x5x4x1xf32, #tpu.memory_space<vmem>>, vector<1x1x4x1xf32>
    %54 = vector.shape_cast %53 : vector<1x1x4x1xf32> to vector<4x1xf32>
    %55 = vector.shape_cast %52 : vector<4x1xf32> to vector<1x1x4x1xf32>
    tpu.vector_store %arg3[%c0_45, %c4_46, %c0_47, %c0_48], %55 {strides = array<i32>} : memref<1x5x4x1xf32, #tpu.memory_space<vmem>>, vector<1x1x4x1xf32>,
    return
  }
  func.func @transform_0(%arg0: i32, %arg1: i32) -> (i32, i32, i32, i32) {
    %c0_i32 = arith.constant 0 : i32
    %c0_i32_0 = arith.constant 0 : i32
    %c0_i32_1 = arith.constant 0 : i32
    return %arg0, %c0_i32, %c0_i32_0, %arg1 : i32, i32, i32, i32
  }
  func.func @transform_1(%arg0: i32, %arg1: i32) -> (i32, i32, i32, i32) {
    %c0_i32 = arith.constant 0 : i32
    %c0_i32_0 = arith.constant 0 : i32
    %c0_i32_1 = arith.constant 0 : i32
    %c0_i32_2 = arith.constant 0 : i32
    return %arg0, %c0_i32, %c0_i32_0, %c0_i32_1 : i32, i32, i32, i32
  }
}

</mosaic_0001>

<bundles_post_ra>
// kernel: tpu_custom_call.1
= control target key start
LH: loop header
LB: loop body
LE: loop exit
PB: predicated region body
PF: predicated region fallthrough
CT: control target
= control target key end

     0   :  { %6 = vsyncpa [#allocation3], 0  ;;  %s617_s0 = inlined_call_operand.hbm [shape: f32[2,2,4,16], index: 0, kind: input, shape index: {}]   ;;  %s618_s1 = inlined_call_operand.vmem [shape: f32[2,5,4,1], index: 1, kind: output, shape index: {}]  }
   0x1   :  { %8 = vsyncpa [#allocation3 + $0x1], 0  ;;  %s461_s6 = smov 0   ;;  %s463_s7 = smov 0  }
   0x2   :  { %s465_s8 = smov 0   ;;  %s467_s9 = smov 0  }
   0x3   :  { %s469_s10 = smov 0   ;;  %s471_s11 = smov 0  }
   0x4 LB: > { %s285_s12 = sadd.s32 4294967295, %s445_s11   ;;  %s26_s13 = sadd.s32 1, %s441_s10  ;;  %s445_s11 = sphi %s471_s11, %s14_s11   ;;  %s441_s10 = sphi %s469_s10, %s626_s10   ;;  %s437_s9 = sphi %s467_s9, %s625_s9   ;;  %s433_s8 = sphi %s465_s8, %s624_s8   ;;  %s429_s7 = sphi %s463_s7, %s623_s7   ;;  %s425_s6 = sphi %s461_s6, %s622_s6  }
   0x5   : > { %p28_p0 = scmp.ge.s32.totalorder %s26_s13, 2  ;;  %s35_s14 = sadd.s32 1, %s433_s8 }
   0x6   : > { %p42_p1 = scmp.ne.s32.totalorder %s433_s8, %s429_s7  ;;  %p43_p2 = scmp.eq.s32.totalorder %s445_s11, 0 }
   0x7   : > { %s628_s13 = smov (%p28_p0, %s26_s13), 0  ;;  %p48_p4 = scmp.ne.s32.totalorder %s429_s7, %s425_s6 }
   0x8   : > { %p497_p3 = por %p43_p2, %p42_p1  ;;  %s30_s16 = ssub.s32 %s441_s10, %s628_s13 }
   0x9   : > { %p49_p5 = scmp.eq.s32.totalorder %s285_s12, 0  ;;  %p33_p6 = scmp.eq.s32.totalorder %s30_s16, 0 }
   0xa   : > { %p313_p8 = scmp.lt.s32.totalorder %s445_s11, 2  ;;  %s98_s19 = sand.u32 1, %s433_s8  }
   0xb   : > { %p504_p7 = por %p49_p5, %p48_p4  ;;  %s305_s20 = sshll.u32 %s441_s10, 7 }
   0xc   : > { %s510_s18 = scalar_select %p33_p6, %s433_s8, %s35_s14  }
   0xd   : > { %s289_s21 = sshll.u32 %s98_s19, 3  ;;  %s517_s24 = scalar_lea.hbm %s617_s0, %s305_s20 }
   0xe   : > { %s102_s25 = scalar_lea.vmem [#allocation2], %s289_s21  ;;  %p521_p9 = pnand %p313_p8, %p497_p3 }
   0xf   : > { %s110_s26 = sshll.u32 %s102_s25, 4  ;;  %s527_s28 = scalar_lea.sflag [#allocation3], %s98_s19  ;;  %s525_s26 = int_to_ptr.vmem [resolvable:$true] %s110_s26 }
  0x10   : > { %s365_s29 = scalar_lea.hbm %s517_s24, 128  ;;  %p367_p11 = pneg %p521_p9 }
  0x11   : > { %p366_p10 = scmp.ne.s32.totalorder %s517_s24, %s365_s29  ;;  %s370_s3 = scalar_lea.hbm %s617_s0, 256 }
  0x12   : > { %p371_p0 = scmp.lt.u32.totalorder %s517_s24, %s617_s0  ;;  %p372_p1 = scmp.lt.u32.totalorder %s370_s3, %s365_s29 }
  0x13   : > { %p368_p12 = pnand %p367_p11, %p366_p10  ;;  %p374_p3 = scmp.lt.u32.totalorder %s365_s29, %s517_s24 }
  0x14   : > { %p373_p2 = por %p372_p1, %p371_p0 }
  0x15   : > { %p369_p13 = pneg %p368_p12 }
  0x16   : > { %p375_p4 = por %p374_p3, %p373_p2 }
  0x18   : > { %p376_p5 = pnand %p375_p4, %p369_p13 }
  0x1a   : > { %379 = shalt.err (!%p376_p5)
}
  0x1b   : > { %s380_s6 = scalar_lea.vmem %s525_s26, 128  ;;  %s447_s12 = smov [#allocation2]  }
  0x1c   : > { %p381_p6 = scmp.ne.s32.totalorder %s525_s26, %s380_s6  ;;  %s385_s14 = sshll.u32 %s447_s12, 4  ;;  %s386_s14 = int_to_ptr.vmem [resolvable:$false] %s385_s14 }
  0x1d   : > { %s387_s15 = scalar_lea.vmem %s386_s14, 256  ;;  %p388_p12 = scmp.lt.s32.totalorder %s525_s26, %s386_s14 }
  0x1e   : > { %p383_p8 = pnand %p381_p6, %p367_p11  ;;  %p389_p0 = scmp.lt.s32.totalorder %s387_s15, %s380_s6 }
  0x20   : > { %p384_p10 = pneg %p383_p8  ;;  %p390_p1 = por %p389_p0, %p388_p12 }
  0x22   : > { %p391_p2 = pnand %p390_p1, %p384_p10 }
  0x24   : > { %394 = shalt.err (!%p391_p2)
}
  0x25   : > { %s448_s16 = smov 64   ;;  %s449_s19 = smov 4  }
  0x26   : > { %312 = dma.hbm_to_vmem [thread:$0]  (!%p521_p9), %s517_s24, 128, %s525_s26, %s527_s28, %s448_s16, %s448_s16, %s449_s19  }
  0x27   : > { %p292_p11 = scmp.ge.s32.totalorder %s445_s11, 1  ;;  %p118_p13 = scmp.lt.s32.totalorder %s445_s11, 3 }
  0x29   : > { %p119_p3 = pnand %p292_p11, %p118_p13 }
  0x2a   : > { %s124_s20 = sand.u32 (!%p119_p3), 1, %s429_s7  }
  0x2b   : > { %122 = sbr.rel (%p119_p3) target bundleno = 206 (0xce), region = 24  ;;  %s293_s21 = sshll.u32 (!%p119_p3), %s124_s20, 3 }
  0x2c   : > { %s125_s22 = scalar_lea.sflag (!%p119_p3), [#allocation3], %s124_s20  ;;  %s128_s23 = scalar_lea.vmem (!%p119_p3), [#allocation2], %s293_s21 }
  0x32   : > { %420 = dma.done.wait (%p504_p7), %s125_s22, 128  }
  0x33   : > { %422 = vsyncadd (%p504_p7), %s125_s22, 4294967168  ;;  %p147_p4 = scmp.lt.s32.totalorder %s437_s9, 1  ;;  %vm156_vm0 = vcmask 3072   ;;  %vm165_vm1 = vcmask 125952   ;;  %v162_v0 = vld [vmem:[%s128_s23] sm:$0xf] }
  0x34   : > { %v163_v1 = vld [vmem:[%s128_s23 + $0x4] sm:$0xf]  ;;  %v450_v2 = vmov 0.0   ;;  %v166_v3 = vsel %vm165_vm1, %v162_v0, 0.0  ;;  %v183_v4 = vmul.f32 %v162_v0, %v162_v0 }
  0x35   : > { %s630_s9 = smov (!%p147_p4, %s437_s9), 1  ;;  %v192_v5 = vmul.f32 %v163_v1, %v163_v1  ;;  %167 = vadd.xlane.f32.xlu0 %v166_v3  ;;  %v175_v7 = vsel %vm165_vm1, %v163_v1, 0.0  ;;  %v201_v8 = vmul.f32 %v163_v1, %v162_v0 }
  0x36   : > { %s306_s24 = smul.u32 20, %s630_s9  ;;  %v184_v6 = vsel %vm165_vm1, %v183_v4, 0.0 }
  0x37   : > { %185 = vadd.xlane.f32.xlu1 %v184_v6  ;;  %v193_v9 = vsel %vm165_vm1, %v192_v5, 0.0  ;;  %v202_v10 = vsel %vm165_vm1, %v201_v8, 0.0 }
  0x38   : > { %s567_s27 = scalar_lea.vmem %s618_s1, %s306_s24 }
  0x39   : > { %157 = vst.msk [vmem:[%s567_s27] sm:$0xf] %vm156_vm0, %v450_v2  ;;  %158 = vst.msk [vmem:[%s567_s27 + $0x4] sm:$0xf] %vm156_vm0, %v450_v2  ;;  %176 = vadd.xlane.f32.xlu0 %v175_v7 }
  0x3a   : > { %159 = vst.msk [vmem:[%s567_s27 + $0x8] sm:$0xf] %vm156_vm0, %v450_v2  ;;  %160 = vst.msk [vmem:[%s567_s27 + $0xc] sm:$0xf] %vm156_vm0, %v450_v2 }
  0x3b   : > { %161 = vst.msk [vmem:[%s567_s27 + $0x10] sm:$0xf] %vm156_vm0, %v450_v2  ;;  %194 = vadd.xlane.f32.xlu1 %v193_v9 }
  0x3d   : > { %203 = vadd.xlane.f32.xlu0 %v202_v10 }
  0x40   : > { %v164_v11 = vld [vmem:[%s567_s27] sm:$0xf]  ;;  %v295_v16 = vld [vmem:[%s567_s27 + $0x4] sm:$0xf] }
  0x41   : > { %v297_v13 = vld [vmem:[%s567_s27 + $0x8] sm:$0xf]  ;;  %v299_v19 = vld [vmem:[%s567_s27 + $0xc] sm:$0xf] }
  0x42   : > { %v301_v22 = vld [vmem:[%s567_s27 + $0x10] sm:$0xf] }
  0xc2   : > { %v168_v12 = vpop.xlane.xlu0 %167 }
  0xc3   : > { %v170_v14 = vadd.f32 %v168_v12, %v164_v11 }
  0xc4   : > { %v186_v15 = vpop.xlane.xlu1 %185 }
  0xc5   : > { %172 = vst.msk [vmem:[%s567_s27] sm:$0xf] %vm156_vm0, %v170_v14  ;;  %v188_v17 = vadd.f32 %v297_v13, %v186_v15 }
  0xc6   : > { %v177_v18 = vpop.xlane.xlu0 %176 }
  0xc7   : > { %298 = vst.msk [vmem:[%s567_s27 + $0x8] sm:$0xf] %vm156_vm0, %v188_v17  ;;  %v179_v20 = vadd.f32 %v295_v16, %v177_v18 }
  0xc8   : > { %v195_v21 = vpop.xlane.xlu1 %194 }
  0xc9   : > { %296 = vst.msk [vmem:[%s567_s27 + $0x4] sm:$0xf] %vm156_vm0, %v179_v20  ;;  %v197_v23 = vadd.f32 %v299_v19, %v195_v21 }
  0xca   : > { %v204_v24 = vpop.xlane.xlu0 %203 }
  0xcb   : > { %300 = vst.msk [vmem:[%s567_s27 + $0xc] sm:$0xf] %vm156_vm0, %v197_v23  ;;  %v206_v25 = vadd.f32 %v301_v22, %v204_v24 }
  0xcd   : > { %302 = vst.msk [vmem:[%s567_s27 + $0x10] sm:$0xf] %vm156_vm0, %v206_v25 }
  0xce PF: > { %s14_s11 = sadd.s32 1, %s445_s11   ;;  %s622_s6 = smov %s429_s7 }
  0xcf   : > { %p11_p7 = scmp.ge.s32.totalorder %s14_s11, 4   ;;  %s623_s7 = smov %s433_s8 }
  0xd0   : > { %s624_s8 = smov %s510_s18  ;;  %s625_s9 = smov %s441_s10 }
  0xd1   : > { %s626_s10 = smov %s628_s13  ;;  %13 = sbr.rel (!%p11_p7) target bundleno = 4 (0x4), region = 72 }
  0xd8   :  { %229 = vsyncpa [#allocation3], 1 }
  0xd9   :  { %231 = vsyncpa [#allocation3 + $0x1], 1 }

</bundles_post_ra>
